<compile_context>
chip_gen: v7x
topology: tpu7x:2x2x1
jax: 0.10.0
libtpu: 0.0.40
codegen_flags: <defaults>
</compile_context>

<pallas_src>
import jax
import jax.numpy as jnp
from jax.experimental import pallas as pl
from jax.experimental.pallas import tpu as pltpu


_SUBLANE_PACK = {4: 8, 2: 16, 1: 32}   # f32 / bf16 / int8-fp8 sublane packing


def _vmem_capacity_bytes() -> int:
    try:
        info = pltpu.get_tpu_info()
        cap = getattr(info, "vmem_capacity_bytes", None)
        if cap:
            return int(cap)
    except Exception:
        pass
    return 64 * 1024 * 1024            # conservative: assume v7x-sized VMEM


def _vmem_budgets():
    """Return (per-x-buffer byte budget, vmem_limit_bytes), generation-aware."""
    cap = _vmem_capacity_bytes()
    if cap >= 100 * 1024 * 1024:                       # v5e / v6e: 128 MiB
        return 12 * 1024 * 1024, 64 * 1024 * 1024
    return 5 * 1024 * 1024, 48 * 1024 * 1024           # v7x: 64 MiB per TC


def _choose_block_rows(batch: int, input_dim: int, itemsize: int,
                       budget_bytes: int) -> int:
    """Batch-tile height: sized by byte budget, multiple of 128 (or sublane pack)."""
    pack = _SUBLANE_PACK.get(itemsize, 8)
    rows = budget_bytes // max(1, input_dim * itemsize)
    if rows >= batch:
        return batch                   # whole batch fits in one block
    if rows >= 128:
        rows -= rows % 128             # lane/sublane friendly large tiles
    else:
        rows = max(pack, rows - rows % pack)
    return rows


def _linear_kernel(x_ref, w_ref, b_ref, o_ref):
    # x_ref: (TB, D)  streamed / double-buffered input row tile
    # w_ref: (D, 1)   weight column, resident across the grid (constant index_map)
    # b_ref: (1, 1)   SMEM scalar bias
    # o_ref: (TB, 1)  output tile
    acc = jnp.dot(x_ref[...], w_ref[...], preferred_element_type=jnp.float32)
    o_ref[...] = (acc + b_ref[0, 0]).astype(o_ref.dtype)


def simple_linear_model(x, weight, bias, *, block_rows=None):
    """Forward pass of SimpleLinearModel: y = x @ weight.T + bias.

    x:      (batch, input_dim)
    weight: (1, input_dim)   (PyTorch nn.Linear layout)
    bias:   (1,)
    returns (batch, 1)
    """
    batch, input_dim = x.shape
    budget_bytes, vmem_limit = _vmem_budgets()
    tb = (block_rows if block_rows is not None
          else _choose_block_rows(batch, input_dim, x.dtype.itemsize, budget_bytes))
    tb = min(tb, batch)
    grid = pl.cdiv(batch, tb)          # last block may be ragged; writes are clipped

    w_col = weight.reshape(input_dim, 1)   # contiguous reshape, no HBM transpose
    b2 = bias.reshape(1, 1)

    out = pl.pallas_call(
        _linear_kernel,
        out_shape=jax.ShapeDtypeStruct((batch, 1), x.dtype),
        grid_spec=pltpu.PrefetchScalarGridSpec(
            num_scalar_prefetch=0,
            grid=(grid,),
            in_specs=[
                pl.BlockSpec((tb, input_dim), lambda i: (i, 0)),     # streamed x tile
                pl.BlockSpec((input_dim, 1), lambda i: (0, 0)),      # resident weight col
                pl.BlockSpec(memory_space=pltpu.SMEM),               # scalar bias
            ],
            out_specs=pl.BlockSpec((tb, 1), lambda i: (i, 0)),
        ),
        compiler_params=pltpu.CompilerParams(
            dimension_semantics=("parallel",),   # megacore-shard batch tiles
            vmem_limit_bytes=vmem_limit,
        ),
        cost_estimate=pl.CostEstimate(
            flops=int(2 * batch * input_dim),
            transcendentals=0,
            bytes_accessed=int(x.dtype.itemsize)
            * int(batch * input_dim + input_dim + batch),
        ),
    )(x, w_col, b2)
    return out


if __name__ == "__main__":
    key = jax.random.PRNGKey(0)
    kx, kw, kb, kx2 = jax.random.split(key, 4)

    # --- small shape consistent with the module ---
    batch, input_dim = 8, 32
    bound = 1.0 / jnp.sqrt(jnp.float32(input_dim))
    weight = jax.random.uniform(kw, (1, input_dim), jnp.float32, -bound, bound)
    bias = jax.random.uniform(kb, (1,), jnp.float32, -bound, bound)
    x = jax.random.normal(kx, (batch, input_dim), jnp.float32)

    y = simple_linear_model(x, weight, bias)
    jax.block_until_ready(y)
    y_ref = x @ weight.T + bias
    assert y.shape == (batch, 1)
    assert jnp.allclose(y, y_ref, atol=1e-5, rtol=1e-5)

    # --- multi-block path with a ragged last block (no wrapper padding) ---
    batch2, dim2 = 2056, 128
    bound2 = 1.0 / jnp.sqrt(jnp.float32(dim2))
    weight2 = jax.random.uniform(kw, (1, dim2), jnp.float32, -bound2, bound2)
    bias2 = jax.random.uniform(kb, (1,), jnp.float32, -bound2, bound2)
    x2 = jax.random.normal(kx2, (batch2, dim2), jnp.float32)

    y2 = simple_linear_model(x2, weight2, bias2, block_rows=256)  # grid=9, last block 8 rows
    jax.block_until_ready(y2)
    y2_ref = x2 @ weight2.T + bias2
    assert y2.shape == (batch2, 1)
    assert jnp.allclose(y2, y2_ref, atol=1e-4, rtol=1e-5)

    # --- auto-sized (budget-driven) tile path ---
    y3 = simple_linear_model(x2, weight2, bias2)
    jax.block_until_ready(y3)
    assert jnp.allclose(y3, y2_ref, atol=1e-4, rtol=1e-5)

    print("KERNEL_OK")
</pallas_src>

<mosaic_0001>
module attributes {stable_mosaic.version = 11 : i64} {
  func.func @_linear_kernel(%arg0: i32, %arg1: memref<8x32xf32, #tpu.memory_space<vmem>>, %arg2: memref<32x1xf32, #tpu.memory_space<vmem>>, %arg3: memref<1x1xf32, #tpu.memory_space<smem>>, %arg4: memref<8x1xf32, #tpu.memory_space<vmem>>) attributes {dimension_semantics = [#tpu.dimension_semantics<parallel>], iteration_bounds = array<i64: 1>, scalar_prefetch = 0 : i64, scratch_operands = 0 : i64, tpu.core_type = #tpu.core_type<tc>, window_params = [{transform_indices = @transform_0, window_bounds = array<i64: 8, 32>}, {pipeline_mode = #tpu.pipeline_mode<synchronous>, transform_indices = @transform_1, window_bounds = array<i64: 32, 1>}, {transform_indices = @transform_2, window_bounds = array<i64: 1, 1>}, {transform_indices = @transform_3, window_bounds = array<i64: 8, 1>}]} {
    %c0 = arith.constant 0 : index
    %c0_0 = arith.constant 0 : index
    %0 = vector.load %arg1[%c0, %c0_0] : memref<8x32xf32, #tpu.memory_space<vmem>>, vector<8x32xf32>
    %c0_1 = arith.constant 0 : index
    %c0_2 = arith.constant 0 : index
    %1 = vector.load %arg2[%c0_1, %c0_2] : memref<32x1xf32, #tpu.memory_space<vmem>>, vector<32x1xf32>
    %cst = arith.constant dense<0.000000e+00> : vector<8x1xf32>
    %2 = tpu.matmul %0, %1, %cst {dimension_numbers = #tpu.dot_dimension_numbers<[1], [0], [0], [1], [0, 0, 1, 1], [], []>} : vector<8x32xf32>, vector<32x1xf32>, vector<8x1xf32> -> vector<8x1xf32>
    %c0_3 = arith.constant 0 : index
    %c0_4 = arith.constant 0 : index
    %3 = memref.load %arg3[%c0_3, %c0_4] : memref<1x1xf32, #tpu.memory_space<smem>>
    %4 = vector.broadcast %3 : f32 to vector<8x1xf32>
    %5 = arith.addf %2, %4 : vector<8x1xf32>
    %c0_5 = arith.constant 0 : index
    %c0_6 = arith.constant 0 : index
    %6 = vector.load %arg4[%c0_5, %c0_6] : memref<8x1xf32, #tpu.memory_space<vmem>>, vector<8x1xf32>
    tpu.vector_store %arg4[%c0_5, %c0_6], %5 {strides = array<i32>} : memref<8x1xf32, #tpu.memory_space<vmem>>, vector<8x1xf32>,
    return
  }
  func.func @transform_0(%arg0: i32) -> (i32, i32) {
    %c0_i32 = arith.constant 0 : i32
    %c0_i32_0 = arith.constant 0 : i32
    return %arg0, %c0_i32 : i32, i32
  }
  func.func @transform_1(%arg0: i32) -> (i32, i32) {
    %c0_i32 = arith.constant 0 : i32
    %c0_i32_0 = arith.constant 0 : i32
    %c0_i32_1 = arith.constant 0 : i32
    return %c0_i32, %c0_i32_0 : i32, i32
  }
  func.func @transform_2(%arg0: i32) -> (i32, i32) {
    %c0_i32 = arith.constant 0 : i32
    %c0_i32_0 = arith.constant 0 : i32
    %c0_i32_1 = arith.constant 0 : i32
    return %c0_i32, %c0_i32_0 : i32, i32
  }
  func.func @transform_3(%arg0: i32) -> (i32, i32) {
    %c0_i32 = arith.constant 0 : i32
    %c0_i32_0 = arith.constant 0 : i32
    return %arg0, %c0_i32 : i32, i32
  }
}

</mosaic_0001>

<bundles_post_ra>
// kernel: tpu_custom_call.1
= control target key start
LH: loop header
LB: loop body
LE: loop exit
PB: predicated region body
PF: predicated region fallthrough
CT: control target
= control target key end

     0   :  { %v128_v0 = vmov 0.0|0.0   ;;  %vm129_vm0 = vmmov 0   ;;  %v130_v4 = vmov 0.0   ;;  %vm22_vm1 = vcmask 261120   ;;  %s172_s1 = inlined_call_operand.vmem [shape: f32[32,1], index: 1, kind: input, shape index: {}]   ;;  %s173_s0 = inlined_call_operand.vmem [shape: f32[8,32], index: 0, kind: input, shape index: {}]   ;;  %s174_s2 = inlined_call_operand.<no memory space> [shape: f32[1,1], index: 2, kind: input, shape index: {}]   ;;  %s175_s3 = inlined_call_operand.vmem [shape: f32[8,1], index: 3, kind: output, shape index: {}]  }
   0x1   :  { %119 = vmatprep.subr.bf16.mxu0 %v128_v0  ;;  %v16_v1 = vld [vmem:[%s172_s1] sm:$0xff]  ;;  %v17_v2 = vld [vmem:[%s172_s1 + $0x8] sm:$0xff]  ;;  %v18_v3 = vld [vmem:[%s172_s1 + $0x10] sm:$0xff]  ;;  %116 = vmatprep.mubr.msk.f32.mxu0 %vm129_vm0, %v130_v4  ;;  %v21_v9 = vstv %s174_s2  ;;  %vm96_vm2 = vcmask 7168  }
   0x2   :  { %v120_v5 = vpack.c.bf16 %v17_v2, %v16_v1  ;;  %v19_v6 = vld [vmem:[%s172_s1 + $0x18] sm:$0xff]  ;;  %v15_v8 = vld [vmem:[%s173_s0] sm:$0xff] }
   0x3   :  { %v123_v7 = vpack.c.bf16 %v19_v6, %v18_v3 }
   0x4   :  { %121 = vmatpush3.bf16.msra.mxu0 %v120_v5 }
   0x5   :  { %122 = vmatprep.subr.bf16.mxu0 %v128_v0 }
   0x8   :  { %124 = vmatpush3.bf16.msra.mxu0 %v123_v7 }
   0xb   :  { %117 = vmatmul.mubr.msk.f32.vlgmr.msra.gmra.mrb[0].mxu0 %vm22_vm1, %v15_v8 }
  0xde   :  { %v92_v10 = vpop.f32.mrb[0].mxu0 }
  0xdf   :  { %v93_v11 = vadd.f32 %v92_v10, %v21_v9  ;;  %v118_v12 = vpop.f32.mrb[1].mxu0 }
  0xe1   :  { %97 = vst.msk [vmem:[%s175_s3] sm:$0xff] %vm96_vm2, %v93_v11 }

</bundles_post_ra>
